<compile_context>
chip_gen: v7x
topology: tpu7x:2x2x1
jax: 0.10.0
libtpu: 0.0.40
codegen_flags: <defaults>
</compile_context>

<pallas_src>
import jax
import jax.numpy as jnp
from jax import lax
from jax.experimental import pallas as pl
from jax.experimental.pallas import tpu as pltpu

EPS = 1e-5  # nn.BatchNorm2d default eps


# ------------------------------- kernel ----------------------------------

def _fill_vpad(pad_ref, interior_bf16):
    """Write `interior` into rows 1..H of a (N, H+2, W*C) bf16 buffer and zero
    only the top/bottom halo rows.  Every store is full lane width at lane
    offset 0 (no masked / lane-shifted vst)."""
    n, hp, l = pad_ref.shape
    h = hp - 2
    pad_ref[:, 0:1, :] = jnp.zeros((n, 1, l), jnp.bfloat16)
    pad_ref[:, hp - 1:hp, :] = jnp.zeros((n, 1, l), jnp.bfloat16)
    pad_ref[:, 1:h + 1, :] = interior_bf16


def _conv3x3(pad_ref, w_ref):
    """3x3 / pad-1 conv as three ACCUMULATED bf16 MXU matmuls (one per
    vertical tap ky).  Horizontal taps and the 1-px horizontal zero padding
    live inside the banded weight, so there is no lane concatenate / LHS copy.

    pad_ref : (N, H+2, W*Cin)  bf16, vertically zero-padded lane-dense rows
    w_ref   : (3, W*Cin, W*Cout) bf16 banded weights (one slice per ky)
    returns : (N*H, W*Cout) f32
    """
    n, hp, l = pad_ref.shape
    h = hp - 2
    acc = jnp.dot(pad_ref[:, 0:h, :].reshape(n * h, l), w_ref[0],
                  preferred_element_type=jnp.float32)
    for ky in range(1, 3):
        acc += jnp.dot(pad_ref[:, ky:ky + h, :].reshape(n * h, l), w_ref[ky],
                       preferred_element_type=jnp.float32)
    return acc


def _bn_relu(acc, sel_ref, selt_ref, seltg_ref, beta_ref, n_pix):
    """Train-mode BatchNorm (biased batch variance, two-pass/centered) + ReLU
    on a lane-dense (rows, W*C) activation.  `sel` maps lane-space -> channel
    space (sums over W); `selt` maps channel -> lane space; `seltg` is selt
    with gamma pre-folded (saves one per-layer VPU mul)."""
    # TODO(synk): PyTorch training-mode BN also updates running_mean/var
    # buffers as a side effect; that has no tensor output and is not produced.
    sel = sel_ref[...]                                        # (W*C, C)
    mean_c = jnp.dot(jnp.sum(acc, axis=0, keepdims=True), sel,
                     preferred_element_type=jnp.float32) / n_pix
    cen = acc - jnp.dot(mean_c, selt_ref[...],
                        preferred_element_type=jnp.float32)
    var_c = jnp.dot(jnp.sum(cen * cen, axis=0, keepdims=True), sel,
                    preferred_element_type=jnp.float32) / n_pix
    scale = jnp.dot(lax.rsqrt(var_c + EPS), seltg_ref[...],
                    preferred_element_type=jnp.float32)       # gamma folded in
    return jnp.maximum(cen * scale + beta_ref[...], 0.0)      # activation = ReLU


def ynet_block_kernel(x_ref, w1_ref, w2_ref, sel_ref, selt_ref,
                      sg1_ref, b1_ref, sg2_ref, b2_ref,
                      out_ref, pad1_ref, pad2_ref):
    n, hp, _ = pad1_ref.shape
    h = hp - 2
    cout = sel_ref.shape[1]
    w = out_ref.shape[1] // cout
    n_pix = n * h * w

    # ---- conv1 -> BN(batch stats) -> ReLU ----
    _fill_vpad(pad1_ref, x_ref[...].astype(jnp.bfloat16))
    acc1 = _conv3x3(pad1_ref, w1_ref)                         # (N*H, W*Cout) f32
    h1 = _bn_relu(acc1, sel_ref, selt_ref, sg1_ref, b1_ref, n_pix)

    # ---- conv2 -> BN -> ReLU ----
    _fill_vpad(pad2_ref, h1.astype(jnp.bfloat16).reshape(n, h, w * cout))
    acc2 = _conv3x3(pad2_ref, w2_ref)
    out_ref[...] = _bn_relu(acc2, sel_ref, selt_ref, sg2_ref, b2_ref, n_pix)


# ------------------------------ wrapper -----------------------------------

def _banded_conv_weights(w, img_w):
    """PyTorch conv weight (Cout, Cin, 3, 3) -> per-ky banded weights of shape
    (3, img_w*Cin, img_w*Cout).  The horizontal (kx) taps AND the 1-pixel
    horizontal zero padding are folded into the band: output column x reads
    input column jc = x + kx - 1 only when 0 <= jc < img_w.  The kernel LHS is
    therefore the UNPADDED lane-dense row slab and the conv is 3 accumulated
    matmuls (one per vertical tap) -- see _conv3x3."""
    cout, cin, kh, kw = w.shape
    wt = jnp.transpose(w, (2, 3, 1, 0))                       # (ky, kx, cin, cout)
    jc = jnp.arange(img_w)[:, None, None]                     # input column
    x = jnp.arange(img_w)[None, :, None]                      # output column
    kx = jnp.arange(kw)[None, None, :]
    band = (jc == x + kx - 1).astype(w.dtype)                 # (img_w, img_w, kw)
    # Each (jc, x) pair selects at most one kx, so this is a pure selection
    # (no accumulation) -- identical rounding to casting the raw taps to bf16.
    full = jnp.einsum("kKco,jxK->kjcxo", wt, band)            # (ky, jc, cin, x, cout)
    return full.reshape(kh, img_w * cin, img_w * cout)


def ynet_conv_block_nhwc(x_nhwc, params):
    """Forward pass of YNetConvBlock (activation = ReLU), NHWC in / NHWC out.
    NCHW<->NHWC conversion belongs at the model boundary, not per block."""
    n, h, w, cin = x_nhwc.shape
    cout = params["w1"].shape[0]
    lanes = w * cout

    # Lane-dense (N, H, W*Cin) rows: a free contiguous reshape, no transpose.
    x_rows = x_nhwc.reshape(n, h, w * cin)

    # Banded conv weights in bf16 (conv biases dropped: they cancel under
    # train-mode BN; reinstate them if this is ever reused with eval-mode BN).
    w1 = _banded_conv_weights(params["w1"], w).astype(jnp.bfloat16)
    w2 = _banded_conv_weights(params["w2"], w).astype(jnp.bfloat16)

    # Lane-space <-> channel-space selectors; gamma pre-folded into seltg.
    sel = jnp.tile(jnp.eye(cout, dtype=jnp.float32), (w, 1))  # (W*Cout, Cout)
    selt = jnp.transpose(sel)                                 # (Cout, W*Cout)
    sg1 = selt * params["g1"][:, None]
    sg2 = selt * params["g2"][:, None]
    b1 = jnp.tile(params["be1"].reshape(1, cout), (1, w))
    b2 = jnp.tile(params["be2"].reshape(1, cout), (1, w))

    m = n * h * w
    # Honest flops: only true 3x3 MACs (not the zero entries of the band).
    flops = (2 * m * cout * 9 * cin + 2 * m * cout * 9 * cout + 20 * m * cout)
    bytes_accessed = (4 * x_nhwc.size + 2 * (w1.size + w2.size) + 4 * m * cout)

    vmem = pl.BlockSpec(memory_space=pltpu.MemorySpace.VMEM)
    out_rows = pl.pallas_call(
        ynet_block_kernel,
        out_shape=jax.ShapeDtypeStruct((n * h, lanes), jnp.float32),
        in_specs=[vmem] * 9,
        out_specs=vmem,
        scratch_shapes=[
            pltpu.VMEM((n, h + 2, w * cin), jnp.bfloat16),    # v-padded input
            pltpu.VMEM((n, h + 2, w * cout), jnp.bfloat16),   # v-padded stage-1
        ],
        compiler_params=pltpu.CompilerParams(vmem_limit_bytes=32 * 1024 * 1024),
        cost_estimate=pl.CostEstimate(flops=int(flops),
                                      transcendentals=int(2 * cout),
                                      bytes_accessed=int(bytes_accessed)),
    )(x_rows, w1, w2, sel, selt, sg1, b1, sg2, b2)

    # lane-dense (N*H, W*Cout) -> NHWC is a free reshape (stays lane-dense).
    return out_rows.reshape(n, h, w, cout)


# --------------------- pure-JAX reference (verification) -------------------

def ynet_conv_block_ref_nhwc(x_nhwc, params, conv_dtype=jnp.float32):
    """Reference forward (NHWC).  conv_dtype=bfloat16 mirrors the kernel's MXU
    operand precision (f32 accumulation either way); float32 is the exact
    PyTorch-equivalent module."""
    def conv(a, wgt, b):
        wk = jnp.transpose(wgt, (2, 3, 1, 0)).astype(conv_dtype)
        y = lax.conv_general_dilated(
            a.astype(conv_dtype), wk, window_strides=(1, 1), padding="SAME",
            dimension_numbers=("NHWC", "HWIO", "NHWC"),
            preferred_element_type=jnp.float32)
        return y + b

    def bn_relu(y, g, be):
        mean = jnp.mean(y, axis=(0, 1, 2), keepdims=True)
        cen = y - mean
        var = jnp.mean(cen * cen, axis=(0, 1, 2), keepdims=True)
        return jnp.maximum(cen * (lax.rsqrt(var + EPS) * g) + be, 0.0)

    a = bn_relu(conv(x_nhwc, params["w1"], params["b1"]), params["g1"], params["be1"])
    a = bn_relu(conv(a, params["w2"], params["b2"]), params["g2"], params["be2"])
    return a


def init_params(key, in_size, out_size, k=3):
    ks = jax.random.split(key, 4)
    s1 = (2.0 / (in_size * k * k)) ** 0.5
    s2 = (2.0 / (out_size * k * k)) ** 0.5
    return {
        "w1": jax.random.normal(ks[0], (out_size, in_size, k, k), jnp.float32) * s1,
        "b1": jax.random.normal(ks[1], (out_size,), jnp.float32) * 0.1,
        "w2": jax.random.normal(ks[2], (out_size, out_size, k, k), jnp.float32) * s2,
        "b2": jax.random.normal(ks[3], (out_size,), jnp.float32) * 0.1,
        # BatchNorm2d default init: gamma=1, beta=0
        "g1": jnp.ones((out_size,), jnp.float32),
        "be1": jnp.zeros((out_size,), jnp.float32),
        "g2": jnp.ones((out_size,), jnp.float32),
        "be2": jnp.zeros((out_size,), jnp.float32),
    }


if __name__ == "__main__":
    key = jax.random.PRNGKey(0)
    k_x, k_p = jax.random.split(key)

    N, Cin, Cout, H, W = 2, 4, 8, 16, 16
    x_nchw = jax.random.normal(k_x, (N, Cin, H, W), jnp.float32)
    params = init_params(k_p, Cin, Cout)

    # Model-boundary layout conversion: ONCE, outside the block (the block
    # itself is NHWC end-to-end so stacked blocks chain with no transposes).
    x_nhwc = jnp.transpose(x_nchw, (0, 2, 3, 1))

    out = jax.block_until_ready(ynet_conv_block_nhwc(x_nhwc, params))
    assert out.shape == (N, H, W, Cout), out.shape

    # Exactness check against a reference matching the kernel's bf16 MXU
    # operand precision (f32 accumulation).
    ref_bf16 = jax.block_until_ready(
        ynet_conv_block_ref_nhwc(x_nhwc, params, conv_dtype=jnp.bfloat16))
    assert jnp.allclose(out, ref_bf16, rtol=1e-2, atol=1e-2), (
        float(jnp.max(jnp.abs(out - ref_bf16))))

    # Fidelity check against the full-f32 PyTorch-style forward (loose: the
    # only difference is bf16 rounding of the conv operands).
    ref_f32 = jax.block_until_ready(
        ynet_conv_block_ref_nhwc(x_nhwc, params, conv_dtype=jnp.float32))
    assert jnp.allclose(out, ref_f32, rtol=1.5e-1, atol=1.5e-1), (
        float(jnp.max(jnp.abs(out - ref_f32))))

    print("KERNEL_OK")
</pallas_src>

<mosaic_0001>
module attributes {stable_mosaic.version = 11 : i64} {
  func.func @ynet_block_kernel(%arg0: memref<2x16x64xf32, #tpu.memory_space<vmem>>, %arg1: memref<3x64x128xbf16, #tpu.memory_space<vmem>>, %arg2: memref<3x128x128xbf16, #tpu.memory_space<vmem>>, %arg3: memref<128x8xf32, #tpu.memory_space<vmem>>, %arg4: memref<8x128xf32, #tpu.memory_space<vmem>>, %arg5: memref<8x128xf32, #tpu.memory_space<vmem>>, %arg6: memref<1x128xf32, #tpu.memory_space<vmem>>, %arg7: memref<8x128xf32, #tpu.memory_space<vmem>>, %arg8: memref<1x128xf32, #tpu.memory_space<vmem>>, %arg9: memref<32x128xf32, #tpu.memory_space<vmem>>, %arg10: memref<2x18x64xbf16, #tpu.memory_space<vmem>>, %arg11: memref<2x18x128xbf16, #tpu.memory_space<vmem>>) attributes {dimension_semantics = [], scalar_prefetch = 0 : i64, scratch_operands = 2 : i64, tpu.core_type = #tpu.core_type<tc>} {
    %c0 = arith.constant 0 : index
    %c0_0 = arith.constant 0 : index
    %c0_1 = arith.constant 0 : index
    %0 = vector.load %arg0[%c0, %c0_0, %c0_1] : memref<2x16x64xf32, #tpu.memory_space<vmem>>, vector<2x16x64xf32>
    %1 = arith.truncf %0 : vector<2x16x64xf32> to vector<2x16x64xbf16>
    %cst = arith.constant 0.000000e+00 : bf16
    %2 = vector.broadcast %cst : bf16 to vector<2x1x64xbf16>
    %c0_2 = arith.constant 0 : index
    %c0_3 = arith.constant 0 : index
    %c0_4 = arith.constant 0 : index
    %3 = vector.load %arg10[%c0_2, %c0_3, %c0_4] : memref<2x18x64xbf16, #tpu.memory_space<vmem>>, vector<2x1x64xbf16>
    tpu.vector_store %arg10[%c0_2, %c0_3, %c0_4], %2 {strides = array<i32>} : memref<2x18x64xbf16, #tpu.memory_space<vmem>>, vector<2x1x64xbf16>,
    %cst_5 = arith.constant 0.000000e+00 : bf16
    %4 = vector.broadcast %cst_5 : bf16 to vector<2x1x64xbf16>
    %c0_6 = arith.constant 0 : index
    %c17 = arith.constant 17 : index
    %c0_7 = arith.constant 0 : index
    %5 = vector.load %arg10[%c0_6, %c17, %c0_7] : memref<2x18x64xbf16, #tpu.memory_space<vmem>>, vector<2x1x64xbf16>
    tpu.vector_store %arg10[%c0_6, %c17, %c0_7], %4 {strides = array<i32>} : memref<2x18x64xbf16, #tpu.memory_space<vmem>>, vector<2x1x64xbf16>,
    %c0_8 = arith.constant 0 : index
    %c1 = arith.constant 1 : index
    %c0_9 = arith.constant 0 : index
    %6 = vector.load %arg10[%c0_8, %c1, %c0_9] : memref<2x18x64xbf16, #tpu.memory_space<vmem>>, vector<2x16x64xbf16>
    tpu.vector_store %arg10[%c0_8, %c1, %c0_9], %1 {strides = array<i32>} : memref<2x18x64xbf16, #tpu.memory_space<vmem>>, vector<2x16x64xbf16>,
    %c0_10 = arith.constant 0 : index
    %c0_11 = arith.constant 0 : index
    %c0_12 = arith.constant 0 : index
    %7 = vector.load %arg10[%c0_10, %c0_11, %c0_12] : memref<2x18x64xbf16, #tpu.memory_space<vmem>>, vector<2x16x64xbf16>
    %8 = vector.shape_cast %7 : vector<2x16x64xbf16> to vector<32x64xbf16>
    %c0_13 = arith.constant 0 : index
    %c0_14 = arith.constant 0 : index
    %c0_15 = arith.constant 0 : index
    %9 = vector.load %arg1[%c0_13, %c0_14, %c0_15] : memref<3x64x128xbf16, #tpu.memory_space<vmem>>, vector<1x64x128xbf16>
    %10 = vector.shape_cast %9 : vector<1x64x128xbf16> to vector<64x128xbf16>
    %cst_16 = arith.constant dense<0.000000e+00> : vector<32x128xf32>
    %11 = tpu.matmul %8, %10, %cst_16 {dimension_numbers = #tpu.dot_dimension_numbers<[1], [0], [0], [1], [0, 0, 1, 1], [], []>} : vector<32x64xbf16>, vector<64x128xbf16>, vector<32x128xf32> -> vector<32x128xf32>
    %c0_17 = arith.constant 0 : index
    %c1_18 = arith.constant 1 : index
    %c0_19 = arith.constant 0 : index
    %12 = vector.load %arg10[%c0_17, %c1_18, %c0_19] : memref<2x18x64xbf16, #tpu.memory_space<vmem>>, vector<2x16x64xbf16>
    %13 = vector.shape_cast %12 : vector<2x16x64xbf16> to vector<32x64xbf16>
    %c1_20 = arith.constant 1 : index
    %c0_21 = arith.constant 0 : index
    %c0_22 = arith.constant 0 : index
    %14 = vector.load %arg1[%c1_20, %c0_21, %c0_22] : memref<3x64x128xbf16, #tpu.memory_space<vmem>>, vector<1x64x128xbf16>
    %15 = vector.shape_cast %14 : vector<1x64x128xbf16> to vector<64x128xbf16>
    %cst_23 = arith.constant dense<0.000000e+00> : vector<32x128xf32>
    %16 = tpu.matmul %13, %15, %cst_23 {dimension_numbers = #tpu.dot_dimension_numbers<[1], [0], [0], [1], [0, 0, 1, 1], [], []>} : vector<32x64xbf16>, vector<64x128xbf16>, vector<32x128xf32> -> vector<32x128xf32>
    %17 = arith.addf %11, %16 : vector<32x128xf32>
    %c0_24 = arith.constant 0 : index
    %c2 = arith.constant 2 : index
    %c0_25 = arith.constant 0 : index
    %18 = vector.load %arg10[%c0_24, %c2, %c0_25] : memref<2x18x64xbf16, #tpu.memory_space<vmem>>, vector<2x16x64xbf16>
    %19 = vector.shape_cast %18 : vector<2x16x64xbf16> to vector<32x64xbf16>
    %c2_26 = arith.constant 2 : index
    %c0_27 = arith.constant 0 : index
    %c0_28 = arith.constant 0 : index
    %20 = vector.load %arg1[%c2_26, %c0_27, %c0_28] : memref<3x64x128xbf16, #tpu.memory_space<vmem>>, vector<1x64x128xbf16>
    %21 = vector.shape_cast %20 : vector<1x64x128xbf16> to vector<64x128xbf16>
    %cst_29 = arith.constant dense<0.000000e+00> : vector<32x128xf32>
    %22 = tpu.matmul %19, %21, %cst_29 {dimension_numbers = #tpu.dot_dimension_numbers<[1], [0], [0], [1], [0, 0, 1, 1], [], []>} : vector<32x64xbf16>, vector<64x128xbf16>, vector<32x128xf32> -> vector<32x128xf32>
    %23 = arith.addf %17, %22 : vector<32x128xf32>
    %c0_30 = arith.constant 0 : index
    %c0_31 = arith.constant 0 : index
    %24 = vector.load %arg3[%c0_30, %c0_31] : memref<128x8xf32, #tpu.memory_space<vmem>>, vector<128x8xf32>
    %cst_32 = arith.constant dense<0.000000e+00> : vector<128xf32>
    %25 = vector.multi_reduction <add>, %23, %cst_32 [0] : vector<32x128xf32> to vector<128xf32>
    %26 = vector.shape_cast %25 : vector<128xf32> to vector<1x128xf32>
    %cst_33 = arith.constant dense<0.000000e+00> : vector<1x8xf32>
    %27 = tpu.matmul %26, %24, %cst_33 {dimension_numbers = #tpu.dot_dimension_numbers<[1], [0], [0], [1], [0, 0, 1, 1], [], []>} : vector<1x128xf32>, vector<128x8xf32>, vector<1x8xf32> -> vector<1x8xf32>
    %cst_34 = arith.constant 5.120000e+02 : f32
    %28 = vector.broadcast %cst_34 : f32 to vector<1x8xf32>
    %29 = arith.divf %27, %28 : vector<1x8xf32>
    %c0_35 = arith.constant 0 : index
    %c0_36 = arith.constant 0 : index
    %30 = vector.load %arg4[%c0_35, %c0_36] : memref<8x128xf32, #tpu.memory_space<vmem>>, vector<8x128xf32>
    %cst_37 = arith.constant dense<0.000000e+00> : vector<1x128xf32>
    %31 = tpu.matmul %29, %30, %cst_37 {dimension_numbers = #tpu.dot_dimension_numbers<[1], [0], [0], [1], [0, 0, 1, 1], [], []>} : vector<1x8xf32>, vector<8x128xf32>, vector<1x128xf32> -> vector<1x128xf32>
    %32 = vector.broadcast %31 : vector<1x128xf32> to vector<32x128xf32>
    %33 = arith.subf %23, %32 : vector<32x128xf32>
    %34 = arith.mulf %33, %33 : vector<32x128xf32>
    %cst_38 = arith.constant dense<0.000000e+00> : vector<128xf32>
    %35 = vector.multi_reduction <add>, %34, %cst_38 [0] : vector<32x128xf32> to vector<128xf32>
    %36 = vector.shape_cast %35 : vector<128xf32> to vector<1x128xf32>
    %cst_39 = arith.constant dense<0.000000e+00> : vector<1x8xf32>
    %37 = tpu.matmul %36, %24, %cst_39 {dimension_numbers = #tpu.dot_dimension_numbers<[1], [0], [0], [1], [0, 0, 1, 1], [], []>} : vector<1x128xf32>, vector<128x8xf32>, vector<1x8xf32> -> vector<1x8xf32>
    %cst_40 = arith.constant 5.120000e+02 : f32
    %38 = vector.broadcast %cst_40 : f32 to vector<1x8xf32>
    %39 = arith.divf %37, %38 : vector<1x8xf32>
    %cst_41 = arith.constant 9.99999974E-6 : f32
    %40 = vector.broadcast %cst_41 : f32 to vector<1x8xf32>
    %41 = arith.addf %39, %40 : vector<1x8xf32>
    %42 = math.rsqrt %41 : vector<1x8xf32>
    %c0_42 = arith.constant 0 : index
    %c0_43 = arith.constant 0 : index
    %43 = vector.load %arg5[%c0_42, %c0_43] : memref<8x128xf32, #tpu.memory_space<vmem>>, vector<8x128xf32>
    %cst_44 = arith.constant dense<0.000000e+00> : vector<1x128xf32>
    %44 = tpu.matmul %42, %43, %cst_44 {dimension_numbers = #tpu.dot_dimension_numbers<[1], [0], [0], [1], [0, 0, 1, 1], [], []>} : vector<1x8xf32>, vector<8x128xf32>, vector<1x128xf32> -> vector<1x128xf32>
    %45 = vector.broadcast %44 : vector<1x128xf32> to vector<32x128xf32>
    %46 = arith.mulf %33, %45 : vector<32x128xf32>
    %c0_45 = arith.constant 0 : index
    %c0_46 = arith.constant 0 : index
    %47 = vector.load %arg6[%c0_45, %c0_46] : memref<1x128xf32, #tpu.memory_space<vmem>>, vector<1x128xf32>
    %48 = vector.broadcast %47 : vector<1x128xf32> to vector<32x128xf32>
    %49 = arith.addf %46, %48 : vector<32x128xf32>
    %cst_47 = arith.constant 0.000000e+00 : f32
    %50 = vector.broadcast %cst_47 : f32 to vector<32x128xf32>
    %51 = arith.maximumf %49, %50 : vector<32x128xf32>
    %52 = arith.truncf %51 : vector<32x128xf32> to vector<32x128xbf16>
    %53 = vector.shape_cast %52 : vector<32x128xbf16> to vector<2x16x128xbf16>
    %cst_48 = arith.constant 0.000000e+00 : bf16
    %54 = vector.broadcast %cst_48 : bf16 to vector<2x1x128xbf16>
    %c0_49 = arith.constant 0 : index
    %c0_50 = arith.constant 0 : index
    %c0_51 = arith.constant 0 : index
    %55 = vector.load %arg11[%c0_49, %c0_50, %c0_51] : memref<2x18x128xbf16, #tpu.memory_space<vmem>>, vector<2x1x128xbf16>
    tpu.vector_store %arg11[%c0_49, %c0_50, %c0_51], %54 {strides = array<i32>} : memref<2x18x128xbf16, #tpu.memory_space<vmem>>, vector<2x1x128xbf16>,
    %cst_52 = arith.constant 0.000000e+00 : bf16
    %56 = vector.broadcast %cst_52 : bf16 to vector<2x1x128xbf16>
    %c0_53 = arith.constant 0 : index
    %c17_54 = arith.constant 17 : index
    %c0_55 = arith.constant 0 : index
    %57 = vector.load %arg11[%c0_53, %c17_54, %c0_55] : memref<2x18x128xbf16, #tpu.memory_space<vmem>>, vector<2x1x128xbf16>
    tpu.vector_store %arg11[%c0_53, %c17_54, %c0_55], %56 {strides = array<i32>} : memref<2x18x128xbf16, #tpu.memory_space<vmem>>, vector<2x1x128xbf16>,
    %c0_56 = arith.constant 0 : index
    %c1_57 = arith.constant 1 : index
    %c0_58 = arith.constant 0 : index
    %58 = vector.load %arg11[%c0_56, %c1_57, %c0_58] : memref<2x18x128xbf16, #tpu.memory_space<vmem>>, vector<2x16x128xbf16>
    tpu.vector_store %arg11[%c0_56, %c1_57, %c0_58], %53 {strides = array<i32>} : memref<2x18x128xbf16, #tpu.memory_space<vmem>>, vector<2x16x128xbf16>,
    %c0_59 = arith.constant 0 : index
    %c0_60 = arith.constant 0 : index
    %c0_61 = arith.constant 0 : index
    %59 = vector.load %arg11[%c0_59, %c0_60, %c0_61] : memref<2x18x128xbf16, #tpu.memory_space<vmem>>, vector<2x16x128xbf16>
    %60 = vector.shape_cast %59 : vector<2x16x128xbf16> to vector<32x128xbf16>
    %c0_62 = arith.constant 0 : index
    %c0_63 = arith.constant 0 : index
    %c0_64 = arith.constant 0 : index
    %61 = vector.load %arg2[%c0_62, %c0_63, %c0_64] : memref<3x128x128xbf16, #tpu.memory_space<vmem>>, vector<1x128x128xbf16>
    %62 = vector.shape_cast %61 : vector<1x128x128xbf16> to vector<128x128xbf16>
    %cst_65 = arith.constant dense<0.000000e+00> : vector<32x128xf32>
    %63 = tpu.matmul %60, %62, %cst_65 {dimension_numbers = #tpu.dot_dimension_numbers<[1], [0], [0], [1], [0, 0, 1, 1], [], []>} : vector<32x128xbf16>, vector<128x128xbf16>, vector<32x128xf32> -> vector<32x128xf32>
    %c0_66 = arith.constant 0 : index
    %c1_67 = arith.constant 1 : index
    %c0_68 = arith.constant 0 : index
    %64 = vector.load %arg11[%c0_66, %c1_67, %c0_68] : memref<2x18x128xbf16, #tpu.memory_space<vmem>>, vector<2x16x128xbf16>
    %65 = vector.shape_cast %64 : vector<2x16x128xbf16> to vector<32x128xbf16>
    %c1_69 = arith.constant 1 : index
    %c0_70 = arith.constant 0 : index
    %c0_71 = arith.constant 0 : index
    %66 = vector.load %arg2[%c1_69, %c0_70, %c0_71] : memref<3x128x128xbf16, #tpu.memory_space<vmem>>, vector<1x128x128xbf16>
    %67 = vector.shape_cast %66 : vector<1x128x128xbf16> to vector<128x128xbf16>
    %cst_72 = arith.constant dense<0.000000e+00> : vector<32x128xf32>
    %68 = tpu.matmul %65, %67, %cst_72 {dimension_numbers = #tpu.dot_dimension_numbers<[1], [0], [0], [1], [0, 0, 1, 1], [], []>} : vector<32x128xbf16>, vector<128x128xbf16>, vector<32x128xf32> -> vector<32x128xf32>
    %69 = arith.addf %63, %68 : vector<32x128xf32>
    %c0_73 = arith.constant 0 : index
    %c2_74 = arith.constant 2 : index
    %c0_75 = arith.constant 0 : index
    %70 = vector.load %arg11[%c0_73, %c2_74, %c0_75] : memref<2x18x128xbf16, #tpu.memory_space<vmem>>, vector<2x16x128xbf16>
    %71 = vector.shape_cast %70 : vector<2x16x128xbf16> to vector<32x128xbf16>
    %c2_76 = arith.constant 2 : index
    %c0_77 = arith.constant 0 : index
    %c0_78 = arith.constant 0 : index
    %72 = vector.load %arg2[%c2_76, %c0_77, %c0_78] : memref<3x128x128xbf16, #tpu.memory_space<vmem>>, vector<1x128x128xbf16>
    %73 = vector.shape_cast %72 : vector<1x128x128xbf16> to vector<128x128xbf16>
    %cst_79 = arith.constant dense<0.000000e+00> : vector<32x128xf32>
    %74 = tpu.matmul %71, %73, %cst_79 {dimension_numbers = #tpu.dot_dimension_numbers<[1], [0], [0], [1], [0, 0, 1, 1], [], []>} : vector<32x128xbf16>, vector<128x128xbf16>, vector<32x128xf32> -> vector<32x128xf32>
    %75 = arith.addf %69, %74 : vector<32x128xf32>
    %c0_80 = arith.constant 0 : index
    %c0_81 = arith.constant 0 : index
    %76 = vector.load %arg3[%c0_80, %c0_81] : memref<128x8xf32, #tpu.memory_space<vmem>>, vector<128x8xf32>
    %cst_82 = arith.constant dense<0.000000e+00> : vector<128xf32>
    %77 = vector.multi_reduction <add>, %75, %cst_82 [0] : vector<32x128xf32> to vector<128xf32>
    %78 = vector.shape_cast %77 : vector<128xf32> to vector<1x128xf32>
    %cst_83 = arith.constant dense<0.000000e+00> : vector<1x8xf32>
    %79 = tpu.matmul %78, %76, %cst_83 {dimension_numbers = #tpu.dot_dimension_numbers<[1], [0], [0], [1], [0, 0, 1, 1], [], []>} : vector<1x128xf32>, vector<128x8xf32>, vector<1x8xf32> -> vector<1x8xf32>
    %cst_84 = arith.constant 5.120000e+02 : f32
    %80 = vector.broadcast %cst_84 : f32 to vector<1x8xf32>
    %81 = arith.divf %79, %80 : vector<1x8xf32>
    %c0_85 = arith.constant 0 : index
    %c0_86 = arith.constant 0 : index
    %82 = vector.load %arg4[%c0_85, %c0_86] : memref<8x128xf32, #tpu.memory_space<vmem>>, vector<8x128xf32>
    %cst_87 = arith.constant dense<0.000000e+00> : vector<1x128xf32>
    %83 = tpu.matmul %81, %82, %cst_87 {dimension_numbers = #tpu.dot_dimension_numbers<[1], [0], [0], [1], [0, 0, 1, 1], [], []>} : vector<1x8xf32>, vector<8x128xf32>, vector<1x128xf32> -> vector<1x128xf32>
    %84 = vector.broadcast %83 : vector<1x128xf32> to vector<32x128xf32>
    %85 = arith.subf %75, %84 : vector<32x128xf32>
    %86 = arith.mulf %85, %85 : vector<32x128xf32>
    %cst_88 = arith.constant dense<0.000000e+00> : vector<128xf32>
    %87 = vector.multi_reduction <add>, %86, %cst_88 [0] : vector<32x128xf32> to vector<128xf32>
    %88 = vector.shape_cast %87 : vector<128xf32> to vector<1x128xf32>
    %cst_89 = arith.constant dense<0.000000e+00> : vector<1x8xf32>
    %89 = tpu.matmul %88, %76, %cst_89 {dimension_numbers = #tpu.dot_dimension_numbers<[1], [0], [0], [1], [0, 0, 1, 1], [], []>} : vector<1x128xf32>, vector<128x8xf32>, vector<1x8xf32> -> vector<1x8xf32>
    %cst_90 = arith.constant 5.120000e+02 : f32
    %90 = vector.broadcast %cst_90 : f32 to vector<1x8xf32>
    %91 = arith.divf %89, %90 : vector<1x8xf32>
    %cst_91 = arith.constant 9.99999974E-6 : f32
    %92 = vector.broadcast %cst_91 : f32 to vector<1x8xf32>
    %93 = arith.addf %91, %92 : vector<1x8xf32>
    %94 = math.rsqrt %93 : vector<1x8xf32>
    %c0_92 = arith.constant 0 : index
    %c0_93 = arith.constant 0 : index
    %95 = vector.load %arg7[%c0_92, %c0_93] : memref<8x128xf32, #tpu.memory_space<vmem>>, vector<8x128xf32>
    %cst_94 = arith.constant dense<0.000000e+00> : vector<1x128xf32>
    %96 = tpu.matmul %94, %95, %cst_94 {dimension_numbers = #tpu.dot_dimension_numbers<[1], [0], [0], [1], [0, 0, 1, 1], [], []>} : vector<1x8xf32>, vector<8x128xf32>, vector<1x128xf32> -> vector<1x128xf32>
    %97 = vector.broadcast %96 : vector<1x128xf32> to vector<32x128xf32>
    %98 = arith.mulf %85, %97 : vector<32x128xf32>
    %c0_95 = arith.constant 0 : index
    %c0_96 = arith.constant 0 : index
    %99 = vector.load %arg8[%c0_95, %c0_96] : memref<1x128xf32, #tpu.memory_space<vmem>>, vector<1x128xf32>
    %100 = vector.broadcast %99 : vector<1x128xf32> to vector<32x128xf32>
    %101 = arith.addf %98, %100 : vector<32x128xf32>
    %cst_97 = arith.constant 0.000000e+00 : f32
    %102 = vector.broadcast %cst_97 : f32 to vector<32x128xf32>
    %103 = arith.maximumf %101, %102 : vector<32x128xf32>
    %c0_98 = arith.constant 0 : index
    %c0_99 = arith.constant 0 : index
    %104 = vector.load %arg9[%c0_98, %c0_99] : memref<32x128xf32, #tpu.memory_space<vmem>>, vector<32x128xf32>
    tpu.vector_store %arg9[%c0_98, %c0_99], %103 {strides = array<i32>} : memref<32x128xf32, #tpu.memory_space<vmem>>, vector<32x128xf32>,
    return
  }
}

</mosaic_0001>

<bundles_post_ra>
// kernel: tpu_custom_call.1
= control target key start
LH: loop header
LB: loop body
LE: loop exit
PB: predicated region body
PF: predicated region fallthrough
CT: control target
= control target key end

     0   :  { %14 = vsyncpa [#allocation5], 0  ;;  %s2983_s0 = inlined_call_operand.vmem [shape: f32[2,16,64], index: 0, kind: input, shape index: {}]   ;;  %s2984_s1 = inlined_call_operand.vmem [shape: bf16[3,64,128], index: 1, kind: input, shape index: {}]   ;;  %s2985_s2 = inlined_call_operand.hbm [shape: bf16[3,128,128], index: 2, kind: input, shape index: {}]   ;;  %s2986_s3 = inlined_call_operand.vmem [shape: f32[128,8], index: 3, kind: input, shape index: {}]   ;;  %s2987_s4 = inlined_call_operand.vmem [shape: f32[8,128], index: 4, kind: input, shape index: {}]   ;;  %s2988_s5 = inlined_call_operand.vmem [shape: f32[8,128], index: 5, kind: input, shape index: {}]   ;;  %s2989_s6 = inlined_call_operand.vmem [shape: f32[1,128], index: 6, kind: input, shape index: {}]   ;;  %s2990_s7 = inlined_call_operand.vmem [shape: f32[8,128], index: 7, kind: input, shape index: {}]   ;;  %s2991_s8 = inlined_call_operand.vmem [shape: f32[1,128], index: 8, kind: input, shape index: {}]   ;;  %s2992_s9 = inlined_call_operand.hbm [shape: f32[32,128], index: 9, kind: output, shape index: {}]  }
   0x1   :  { %15 = vsyncpa [#allocation6], 0  ;;  %s2474_s30 = smov [#allocation4]   ;;  %s2426_s13 = scalar_lea.hbm %s2985_s2, 3072 }
   0x2   :  { %s25_s10 = sshll.u32 %s2474_s30, 4  ;;  %p2427_p0 = scmp.ne.s32.totalorder %s2985_s2, %s2426_s13  ;;  %s26_s10 = int_to_ptr.vmem [resolvable:$true] %s25_s10 }
   0x3   :  { %p2430_p1 = scmp.lt.u32.totalorder %s2426_s13, %s2985_s2 }
   0x5   :  { %p2432_p2 = pnand %p2430_p1, %p2427_p0 }
   0x7   :  { %2435 = shalt.err (!%p2432_p2)
}
   0x8   :  { %s2436_s18 = scalar_lea.vmem %s26_s10, 3072  ;;  %p2441_p4 = scmp.lt.s32.totalorder %s26_s10, %s26_s10 }
   0x9   :  { %p2437_p3 = scmp.ne.s32.totalorder %s26_s10, %s2436_s18  ;;  %p2442_p5 = scmp.lt.s32.totalorder %s2436_s18, %s2436_s18 }
   0xb   :  { %p2443_p6 = por %p2442_p5, %p2441_p4 }
   0xd   :  { %p2444_p7 = pnand %p2443_p6, %p2437_p3 }
   0xf   :  { %2447 = shalt.err (!%p2444_p7)
}
  0x10   :  { %s2475_s19 = smov 64   ;;  %s2476_s20 = smov 4  }
  0x11   :  { %31 = dma.hbm_to_vmem [thread:$0]  %s2985_s2, 3072, %s26_s10, [#allocation5], %s2475_s19, %s2475_s19, %s2476_s20  }
  0x12   :  { %2470 = dma.done.wait [#allocation5], 3072  }
  0x13   :  { %2471 = vsyncadd [#allocation5], 4294964224  ;;  %vm54_vm0 = vcmask 516096   ;;  %vm55_vm1 = vsmask.f32 256  ;;  %v2477_v0 = vmov 0.0|0.0  }
  0x14   :  { %2261 = vmatprep.subr.bf16.mxu1 %v2477_v0  ;;  %vm2547_vm2 = vmand %vm54_vm0, %vm55_vm1  ;;  %vm63_vm3 = vsmask.f32 7938  ;;  %v2382_v2 = vld [vmem:[%s2984_s1 + $0x20] sm:$0xff]   ;;  %v2383_v3 = vld [vmem:[%s2984_s1 + $0x28] sm:$0xff]   ;;  %vm81_vm5 = vsmask.f32 4368 }
  0x15   :  { %2005 = vmatprep.subr.bf16.mxu0 %v2382_v2  ;;  %vm2558_vm4 = vmand %vm54_vm0, %vm63_vm3  ;;  %v2384_v5 = vld [vmem:[%s2984_s1 + $0x30] sm:$0xff]   ;;  %v48_v6 = vld [vmem:[%s2983_s0] sm:$0xff]  ;;  %vm123_vm6 = vcmask 519168   ;;  %vm154_vm9 = vsmask.f32 3328  ;;  %vm244_vm12 = vcmask 523264  }
  0x16   :  { %2006 = vmatpush3.bf16.msra.mxu0 %v2382_v2  ;;  %v49_v7 = vld [vmem:[%s2983_s0 + $0x8] sm:$0xff]  ;;  %v50_v8 = vld [vmem:[%s2983_s0 + $0x10] sm:$0xff]  ;;  %v51_v9 = vld [vmem:[%s2983_s0 + $0x18] sm:$0xff]  ;;  %v1873_v12 = vpack.c.bf16 %v48_v6, %v48_v6  ;;  %vm155_vm10 = vsmask.f32 7440  ;;  %vm395_vm13 = vcmask 1042432  }
  0x17   :  { %2007 = vmatprep.subr.bf16.mxu0 %v2383_v3  ;;  %v57_v10 = vld [vmem:[#allocation2] sm:$0x1]  ;;  %v60_v11 = vld [vmem:[#allocation2 + $0xc] sm:$0x1]  ;;  %v1874_v13 = vpack.c.bf16 %v49_v7, %v49_v7  ;;  %v1875_v14 = vpack.c.bf16 %v50_v8, %v50_v8  ;;  %v2385_v15 = vld [vmem:[%s2984_s1 + $0x38] sm:$0xff]   ;;  %v1876_v20 = vpack.c.bf16 %v51_v9, %v51_v9  ;;  %vm396_vm14 = vcmask 1046532  }
  0x18   :  { %v58_v16 = vsel %vm2547_vm2, 0, %v57_v10  ;;  %v61_v17 = vsel %vm2547_vm2, 0, %v60_v11  ;;  %v65_v18 = vld [vmem:[#allocation2 + $0x8] sm:$0x1]  ;;  %v68_v19 = vld [vmem:[#allocation2 + $0x14] sm:$0x1]  ;;  %vm2595_vm7 = vmor %vm55_vm1, %vm81_vm5 }
  0x19   :  { %59 = vst [vmem:[#allocation2] sm:$0x1] %v58_v16  ;;  %62 = vst [vmem:[#allocation2 + $0xc] sm:$0x1] %v61_v17  ;;  %v66_v21 = vsel %vm2558_vm4, 0, %v65_v18  ;;  %v69_v22 = vsel %vm2558_vm4, 0, %v68_v19 }
  0x1a   :  { %2008 = vmatpush3.bf16.msra.mxu0 %v2383_v3  ;;  %v84_v23 = vshrl.u32 %v1873_v12, 16  ;;  %v87_v24 = vshll.u32 %v1873_v12, 16  ;;  %67 = vst [vmem:[#allocation2 + $0x8] sm:$0x1] %v66_v21  ;;  %v92_v25 = vshrl.u32 %v1874_v13, 16  ;;  %v95_v26 = vshll.u32 %v1874_v13, 16  ;;  %vm2601_vm8 = vmand %vm123_vm6, %vm63_vm3 }
  0x1b   :  { %2009 = vmatprep.subr.bf16.mxu0 %v2384_v5  ;;  %v101_v27 = vshrl.u32 %v1875_v14, 16  ;;  %v104_v28 = vshll.u32 %v1875_v14, 16  ;;  %70 = vst [vmem:[#allocation2 + $0x14] sm:$0x1] %v69_v22  ;;  %v109_v30 = vshrl.u32 %v1876_v20, 16  ;;  %v112_v31 = vshll.u32 %v1876_v20, 16  ;;  %vm2667_vm11 = vmor %vm154_vm9, %vm155_vm10 }
  0x1c   :  { %v86_v29 = vrot.slane %v84_v23, 7  ;;  %v94_v32 = vrot.slane %v92_v25, 7  ;;  %v2591_v34 = vld [vmem:[%s2984_s1] sm:$0xff]   ;;  %v511_v57 = vld [vmem:[%s2986_s3 + $0x8] sm:$0xff]  ;;  %v512_v58 = vld [vmem:[%s2986_s3 + $0x10] sm:$0xff]  ;;  %vm2478_vm0 = vmmov 0  }
  0x1d   :  { %v103_v33 = vrot.slane %v101_v27, 7  ;;  %v111_v38 = vrot.slane %v109_v30, 7  ;;  %v510_v56 = vld [vmem:[%s2986_s3] sm:$0xff]  ;;  %v513_v59 = vld [vmem:[%s2986_s3 + $0x18] sm:$0xff]  ;;  %v515_v62 = vld [vmem:[%s2986_s3 + $0x28] sm:$0xff]  ;;  %vm875_vm4 = vcmask 1040384  }
  0x1e   :  { %2010 = vmatpush3.bf16.msra.mxu0 %v2384_v5  ;;  %v89_v36 = vor.u32 %v87_v24, %v86_v29  ;;  %v90_v37 = vrot.slane %v86_v29, 4  ;;  %v97_v39 = vor.u32 %v95_v26, %v94_v32  ;;  %v99_v40 = vrot.slane %v94_v32, 4  ;;  %v514_v61 = vld [vmem:[%s2986_s3 + $0x20] sm:$0xff]  ;;  %vm2700_vm15 = vmor %vm395_vm13, %vm396_vm14 }
  0x1f   :  { %2011 = vmatprep.subr.bf16.mxu0 %v2385_v15  ;;  %v106_v41 = vor.u32 %v104_v28, %v103_v33  ;;  %v107_v42 = vrot.slane %v103_v33, 4  ;;  %v114_v44 = vor.u32 %v112_v31, %v111_v38  ;;  %v116_v45 = vrot.slane %v111_v38, 4  ;;  %vm2856_vm5 = vmand %vm875_vm4, %vm55_vm1  ;;  %v2407_v23 = vld [vmem:[#allocation4 + $0x10] sm:$0xff]  }
  0x20   :  { %v98_v46 = vsel %vm2595_vm7, %v90_v37, %v97_v39  ;;  %v125_v47 = vld [vmem:[#allocation2] sm:$0xf]  ;;  %v133_v48 = vld [vmem:[#allocation2 + $0xc] sm:$0xf]  ;;  %v2632_v60 = vpack.c.bf16 %v511_v57, %v510_v56  ;;  %v2643_v1 = vpack.c.bf16 %v513_v59, %v512_v58  ;;  %v2657_v14 = vpack.c.bf16 %v515_v62, %v514_v61  ;;  %v2394_v62 = vld [vmem:[%s2984_s1 + $0x50] sm:$0xff]  }
  0x21   :  { %v115_v49 = vsel %vm2595_vm7, %v107_v42, %v114_v44  ;;  %v126_v50 = vsel %vm2601_vm8, %v89_v36, %v125_v47  ;;  %129 = vst.msk [vmem:[#allocation2 + $0x4] sm:$0xf] %vm123_vm6, %v98_v46  ;;  %v130_v51 = vld [vmem:[#allocation2 + $0x8] sm:$0x1]  ;;  %v134_v52 = vsel %vm2601_vm8, %v106_v41, %v133_v48  ;;  %vm940_vm1 = vcmask 1043456  }
  0x22   :  { %2012 = vmatpush3.bf16.msra.mxu0 %v2385_v15  ;;  %v137_v53 = vld [vmem:[#allocation2 + $0x14] sm:$0x1]  ;;  %127 = vst [vmem:[#allocation2] sm:$0xf] %v126_v50  ;;  %v131_v54 = vsel %vm2547_vm2, %v99_v40, %v130_v51  ;;  %136 = vst.msk [vmem:[#allocation2 + $0x10] sm:$0xf] %vm123_vm6, %v115_v49  ;;  %2263 = vmatpush3.bf16.msra.mxu1 %v2632_v60 }
  0x23   :  { %135 = vst [vmem:[#allocation2 + $0xc] sm:$0xf] %v134_v52  ;;  %2017 = vmatprep.subr.bf16.mxu0 %v2591_v34  ;;  %v138_v55 = vsel %vm2547_vm2, %v116_v45, %v137_v53  ;;  %132 = vst [vmem:[#allocation2 + $0x8] sm:$0x1] %v131_v54  ;;  %2264 = vmatprep.subr.bf16.mxu1 %v2477_v0  ;;  %v2387_v46 = vld [vmem:[%s2984_s1 + $0x8] sm:$0xff]   ;;  %v2388_v52 = vld [vmem:[%s2984_s1 + $0x10] sm:$0xff]  }
  0x24   :  { %139 = vst [vmem:[#allocation2 + $0x14] sm:$0x1] %v138_v55  ;;  %v2389_v53 = vld [vmem:[%s2984_s1 + $0x18] sm:$0xff]   ;;  %v2393_v59 = vld [vmem:[%s2984_s1 + $0x48] sm:$0xff]   ;;  %vm608_vm2 = vcmask 64512   ;;  %vm883_vm6 = vmand %vm875_vm4, %vm63_vm3 }
  0x25   :  { %vm2877_vm8 = vmand %vm940_vm1, %vm63_vm3  ;;  %v2420_v54 = vld [vmem:[#allocation4 + $0xb0] sm:$0xff]  }
  0x26   :  { %2266 = vmatpush3.bf16.msra.mxu1 %v2643_v1 }
  0x27   :  { %2267 = vmatprep.subr.bf16.mxu1 %v2477_v0 }
  0x28   :  { %v2640_v63 = vld [vmem:[#allocation2 + $0x4] sm:$0xf] }
  0x29   :  { %v140_v2 = vld [vmem:[#allocation2] sm:$0xf]  ;;  %v167_v3 = vshll.u32 %v2640_v63, 16  ;;  %v171_v4 = vshrl.u32 %v2640_v63, 16  ;;  %v2652_v9 = vld [vmem:[#allocation2 + $0x10] sm:$0xf] }
  0x2a   :  { %v2647_v5 = vld [vmem:[#allocation2 + $0xc] sm:$0xf]  ;;  %v2650_v6 = vld [vmem:[#allocation2 + $0x8] sm:$0x1]  ;;  %v158_v7 = vshrl.u32 %v140_v2, 16  ;;  %v161_v8 = vshll.u32 %v140_v2, 16  ;;  %2269 = vmatpush3.bf16.msra.mxu1 %v2657_v14  ;;  %v1805_v50 = vcombine.low %v140_v2, %v2640_v63 }
  0x2b   :  { %v169_v10 = vrot.slane %v167_v3, 5  ;;  %v173_v11 = vrot.slane %v171_v4, 4  ;;  %v177_v12 = vshll.u32 %v2650_v6, 16  ;;  %v2655_v13 = vld [vmem:[#allocation2 + $0x14] sm:$0x1]  ;;  %v182_v17 = vshrl.u32 %v2647_v5, 16  ;;  %2270 = vmatprep.subr.bf16.mxu1 %v2477_v0 }
  0x2c   :  { %v160_v15 = vrot.slane %v158_v7, 4  ;;  %v163_v16 = vrot.slane %v161_v8, 5  ;;  %v185_v18 = vshll.u32 %v2647_v5, 16  ;;  %v191_v21 = vshll.u32 %v2652_v9, 16  ;;  %v389_v31 = vld [vmem:[#allocation2] sm:$0xe] }
  0x2d   :  { %v174_v19 = vor.u32 %v173_v11, %v169_v10  ;;  %v179_v20 = vrot.slane %v177_v12, 5  ;;  %v195_v22 = vshrl.u32 %v2652_v9, 16  ;;  %v184_v25 = vrot.slane %v182_v17, 4  ;;  %v518_v12 = vld [vmem:[%s2986_s3 + $0x40] sm:$0xff]  ;;  %v521_v17 = vld [vmem:[%s2986_s3 + $0x58] sm:$0xff] }
  0x2e   :  { %v164_v24 = vor.u32 %v163_v16, %v160_v15  ;;  %v187_v26 = vrot.slane %v185_v18, 5  ;;  %v201_v27 = vshll.u32 %v2655_v13, 16  ;;  %v193_v29 = vrot.slane %v191_v21, 5  ;;  %v520_v16 = vld [vmem:[%s2986_s3 + $0x50] sm:$0xff] }
  0x2f   :  { %v175_v28 = vrot.slane %v174_v19, 4  ;;  %v197_v30 = vrot.slane %v195_v22, 4  ;;  %v400_v39 = vrot.slane %v2640_v63, 5  ;;  %v403_v43 = vrot.slane %v2650_v6, 5  ;;  %v390_v63 = vld [vmem:[#allocation2 + $0xc] sm:$0xe] }
  0x30   :  { %v165_v32 = vrot.slane %v164_v24, 4  ;;  %v188_v33 = vor.u32 %v187_v26, %v184_v25  ;;  %v203_v38 = vrot.slane %v201_v27, 5  ;;  %v1813_v47 = vrot.slane %v389_v31, 9  ;;  %v522_v19 = vld [vmem:[%s2986_s3 + $0x60] sm:$0xff]  ;;  %v524_v21 = vld [vmem:[%s2986_s3 + $0x70] sm:$0xff]  ;;  %v525_v24 = vld [vmem:[%s2986_s3 + $0x78] sm:$0xff] }
  0x31   :  { %v180_v36 = vsel %vm2667_vm11, %v175_v28, %v179_v20  ;;  %v198_v37 = vor.u32 %v197_v30, %v193_v29  ;;  %v402_v48 = vrot.slane %v400_v39, 4  ;;  %v1806_v57 = vcombine.low %v2647_v5, %v2652_v9  ;;  %v2395_v5 = vld [vmem:[%s2984_s1 + $0x58] sm:$0xff]   ;;  %v523_v20 = vld [vmem:[%s2986_s3 + $0x68] sm:$0xff] }
  0x32   :  { %v170_v40 = vsel %vm2667_vm11, %v165_v32, %v169_v10  ;;  %v189_v41 = vrot.slane %v188_v33, 4  ;;  %v401_v55 = vsel %vm2700_vm15, %v1813_v47, %v400_v39  ;;  %v407_v61 = vrot.slane %v2652_v9, 5  ;;  %v516_v9 = vld [vmem:[%s2986_s3 + $0x30] sm:$0xff]  ;;  %v517_v10 = vld [vmem:[%s2986_s3 + $0x38] sm:$0xff] }
  0x33   :  { %v1797_v42 = vcombine.low %v170_v40, %v180_v36  ;;  %v199_v44 = vrot.slane %v198_v37, 4  ;;  %v404_v56 = vsel %vm2700_vm15, %v402_v48, %v403_v43  ;;  %v410_v2 = vrot.slane %v2655_v13, 5  ;;  %v519_v13 = vld [vmem:[%s2986_s3 + $0x48] sm:$0xff] }
  0x34   :  { %v194_v45 = vsel %vm2667_vm11, %v189_v41, %v193_v29  ;;  %v1823_v58 = vcombine.low %v401_v55, %v404_v56  ;;  %v1814_v3 = vrot.slane %v390_v63, 9  ;;  %v409_v4 = vrot.slane %v407_v61, 4 }
  0x35   :  { %2013 = vmatprep.mubr.msk.bf16.mxu0 %vm244_vm12, %v1797_v42  ;;  %v204_v49 = vsel %vm2667_vm11, %v199_v44, %v203_v38  ;;  %v2737_v11 = vpack.c.bf16 %v517_v10, %v516_v9  ;;  %v2747_v15 = vpack.c.bf16 %v519_v13, %v518_v12  ;;  %v2757_v18 = vpack.c.bf16 %v521_v17, %v520_v16  ;;  %v2786_v42 = vld [vmem:[%s2987_s4] sm:$0xff]  ;;  %v2396_v17 = vld [vmem:[#allocation4 + $0x40] sm:$0xff]  }
  0x36   :  { %v1798_v51 = vcombine.low %v194_v45, %v204_v49  ;;  %v408_v6 = vsel %vm2700_vm15, %v1814_v3, %v407_v61  ;;  %v411_v7 = vsel %vm2700_vm15, %v409_v4, %v410_v2  ;;  %v2770_v22 = vpack.c.bf16 %v523_v20, %v522_v19  ;;  %v877_v20 = vld [vmem:[#allocation3] sm:$0x1] }
  0x37   :  { %v1824_v8 = vcombine.low %v408_v6, %v411_v7  ;;  %2272 = vmatpush3.bf16.msra.mxu1 %v2737_v11  ;;  %v2479_v25 = vmov 0.0   ;;  %v2778_v26 = vpack.c.bf16 %v525_v24, %v524_v21  ;;  %v880_v21 = vld [vmem:[#allocation3 + $0xc] sm:$0x1]  ;;  %v878_v24 = vsel %vm2856_vm5, 0, %v877_v20 }
  0x38   :  { %2014 = vmatmul.mubr.msk.bf16.vlgmr.msra.gmra.mrb[0].mxu0 %vm244_vm12, %v1798_v51  ;;  %2273 = vmatprep.subr.bf16.mxu1 %v2477_v0  ;;  %879 = vst [vmem:[#allocation3] sm:$0x1] %v878_v24 }
  0x39   :  { %2018 = vmatpush3.bf16.msra.mxu0 %v2591_v34  ;;  %2025 = vmatprep.mubr.msk.bf16.mxu0 %vm244_vm12, %v1805_v50  ;;  %v2391_v34 = vld [vmem:[%s2984_s1 + $0x40] sm:$0xff]  }
  0x3a   :  { %2019 = vmatprep.subr.bf16.mxu0 %v2387_v46  ;;  %2073 = vmatprep.mubr.msk.f32.mxu1 %vm2478_vm0, %v2479_v25 }
  0x3b   :  { %2275 = vmatpush3.bf16.msra.mxu1 %v2747_v15 }
  0x3c   :  { %2276 = vmatprep.subr.bf16.mxu1 %v2477_v0 }
  0x3d   :  { %2020 = vmatpush3.bf16.msra.mxu0 %v2387_v46  ;;  %v682_v46 = vlaneseq }
  0x3e   :  { %2021 = vmatprep.subr.bf16.mxu0 %v2388_v52 }
  0x3f   :  { %2278 = vmatpush3.bf16.msra.mxu1 %v2757_v18  ;;  %v683_v47 = vshrl.u32 %v682_v46, 7  ;;  %v1833_v46 = vld [vmem:[%s2989_s6] ss:$0 sm:$0xff] }
  0x40   :  { %2279 = vmatprep.subr.bf16.mxu1 %v2477_v0 }
  0x41   :  { %2022 = vmatpush3.bf16.msra.mxu0 %v2388_v52  ;;  %v2811_v48 = vsub.s32 0, %v683_v47 }
  0x42   :  { %2023 = vmatprep.subr.bf16.mxu0 %v2389_v53 }
  0x43   :  { %2281 = vmatpush3.bf16.msra.mxu1 %v2770_v22 }
  0x44   :  { %2282 = vmatprep.subr.bf16.mxu1 %v2477_v0 }
  0x45   :  { %2024 = vmatpush3.bf16.msra.mxu0 %v2389_v53 }
  0x46   :  { %2029 = vmatprep.subr.bf16.mxu0 %v2391_v34 }
  0x47   :  { %2284 = vmatpush3.bf16.msra.mxu1 %v2778_v26 }
  0x48   :  { %2026 = vmatmul.mubr.msk.bf16.vlgmr.msra.gmra.mrb[0].mxu0 %vm244_vm12, %v1806_v57  ;;  %2076 = vmatprep.subr.mxu1 %v2479_v25 }
  0x49   :  { %2030 = vmatpush3.bf16.msra.mxu0 %v2391_v34  ;;  %2037 = vmatprep.mubr.msk.bf16.mxu0 %vm244_vm12, %v1823_v58 }
  0x4a   :  { %2031 = vmatprep.subr.bf16.mxu0 %v2393_v59 }
  0x4d   :  { %2032 = vmatpush3.bf16.msra.mxu0 %v2393_v59 }
  0x4e   :  { %2033 = vmatprep.subr.bf16.mxu0 %v2394_v62 }
  0x51   :  { %2034 = vmatpush3.bf16.msra.mxu0 %v2394_v62 }
  0x52   :  { %2035 = vmatprep.subr.bf16.mxu0 %v2395_v5 }
  0x55   :  { %2036 = vmatpush3.bf16.msra.mxu0 %v2395_v5 }
  0x56   :  { %2121 = vmatprep.subr.bf16.mxu0 %v2396_v17 }
  0x58   :  { %2038 = vmatmul.mubr.msk.bf16.vlgmr.msra.gmra.mrb[0].mxu0 %vm244_vm12, %v1824_v8  ;;  %v776_v8 = vld [vmem:[%s2988_s5] sm:$0xff] }
  0x59   :  { %2122 = vmatpush3.bf16.msra.mxu0 %v2396_v17 }
 0x12b   :  { %v2039_v27 = vpop.f32.mrb[0].mxu0 }
 0x12c   :  { %v491_v28 = vpop.f32.mrb[1].mxu0 }
 0x12d   :  { %v2040_v29 = vpop.f32.mrb[2].mxu0 }
 0x12e   :  { %v494_v30 = vpop.f32.mrb[3].mxu0 }
 0x12f   :  { %v526_v31 = vadd.f32 %v494_v30, %v491_v28 }
 0x131   :  { %v527_v32 = vadd.f32 %v2039_v27, %v526_v31 }
 0x133   :  { %v528_v33 = vadd.f32 %v2040_v29, %v527_v32  ;;  %v2397_v32 = vld [vmem:[#allocation4 + $0x48] sm:$0xff]  }
 0x134   :  { %2123 = vmatprep.subr.bf16.mxu0 %v2397_v32 }
 0x135   :  { %v529_v36 = vrot.slane %v528_v33, 4  ;;  %2124 = vmatpush3.bf16.msra.mxu0 %v2397_v32 }
 0x137   :  { %v530_v37 = vadd.f32 %v529_v36, %v528_v33  ;;  %v2398_v33 = vld [vmem:[#allocation4 + $0x50] sm:$0xff]   ;;  %v2399_v36 = vld [vmem:[#allocation4 + $0x58] sm:$0xff]  }
 0x138   :  { %2125 = vmatprep.subr.bf16.mxu0 %v2398_v33 }
 0x139   :  { %v531_v38 = vrot.slane %v530_v37, 2  ;;  %2126 = vmatpush3.bf16.msra.mxu0 %v2398_v33 }
 0x13a   :  { %2127 = vmatprep.subr.bf16.mxu0 %v2399_v36 }
 0x13b   :  { %v532_v39 = vadd.f32 %v531_v38, %v530_v37  ;;  %v2400_v37 = vld [vmem:[#allocation4 + $0x60] sm:$0xff]   ;;  %v2401_v38 = vld [vmem:[#allocation4 + $0x68] sm:$0xff]  }
 0x13d   :  { %v533_v40 = vrot.slane %v532_v39, 1  ;;  %2128 = vmatpush3.bf16.msra.mxu0 %v2399_v36 }
 0x13e   :  { %2129 = vmatprep.subr.bf16.mxu0 %v2400_v37 }
 0x13f   :  { %v534_v41 = vadd.f32 %v533_v40, %v532_v39  ;;  %v2402_v39 = vld [vmem:[#allocation4 + $0x70] sm:$0xff]   ;;  %v2403_v40 = vld [vmem:[#allocation4 + $0x78] sm:$0xff]  }
 0x141   :  { %2074 = vmatmul.mubr.f32.vlgmr.msra.gmra.mrb[0].mxu1 %v534_v41  ;;  %2130 = vmatpush3.bf16.msra.mxu0 %v2400_v37  ;;  %v2865_v41 = vld [vmem:[#allocation4] sm:$0xff]  }
 0x142   :  { %2077 = vmatpush3.msra.mxu1 %v2786_v42  ;;  %2078 = vmatprep.mubr.msk.f32.mxu1 %vm2478_vm0, %v2479_v25 }
 0x143   :  { %2285 = vmatprep.subr.bf16.mxu1 %v2477_v0  ;;  %2131 = vmatprep.subr.bf16.mxu0 %v2401_v38 }
 0x145   :  { %2132 = vmatpush3.bf16.msra.mxu0 %v2401_v38 }
 0x146   :  { %2133 = vmatprep.subr.bf16.mxu0 %v2402_v39 }
 0x149   :  { %2134 = vmatpush3.bf16.msra.mxu0 %v2402_v39 }
 0x14a   :  { %2135 = vmatprep.subr.bf16.mxu0 %v2403_v40 }
 0x14d   :  { %2136 = vmatpush3.bf16.msra.mxu0 %v2403_v40 }
 0x14e   :  { %2141 = vmatprep.subr.bf16.mxu0 %v2865_v41 }
 0x214   :  { %v601_v43 = vpop.f32.mrb[0].mxu1 }
 0x215   :  { %v606_v44 = vmul.f32 0.001953125, %v601_v43  ;;  %v2075_v45 = vpop.f32.mrb[1].mxu1 }
 0x217   :  { %2079 = vmatmul.mubr.msk.f32.vlgmr.msra.gmra.mrb[2].mxu1 %vm608_vm2, %v606_v44 }
 0x218   :  { %2287 = vmatpush3.bf16.msra.mxu1 %v2632_v60  ;;  %2113 = vmatprep.mubr.msk.f32.mxu1 %vm2478_vm0, %v2479_v25 }
 0x219   :  { %2288 = vmatprep.subr.bf16.mxu1 %v2477_v0 }
 0x21c   :  { %2290 = vmatpush3.bf16.msra.mxu1 %v2643_v1 }
 0x21d   :  { %2291 = vmatprep.subr.bf16.mxu1 %v2477_v0 }
 0x220   :  { %2293 = vmatpush3.bf16.msra.mxu1 %v2657_v14 }
 0x221   :  { %2294 = vmatprep.subr.bf16.mxu1 %v2477_v0 }
 0x224   :  { %2296 = vmatpush3.bf16.msra.mxu1 %v2737_v11 }
 0x225   :  { %2297 = vmatprep.subr.bf16.mxu1 %v2477_v0 }
 0x228   :  { %2299 = vmatpush3.bf16.msra.mxu1 %v2747_v15 }
 0x229   :  { %2300 = vmatprep.subr.bf16.mxu1 %v2477_v0 }
 0x22c   :  { %2302 = vmatpush3.bf16.msra.mxu1 %v2757_v18 }
 0x22d   :  { %2303 = vmatprep.subr.bf16.mxu1 %v2477_v0 }
 0x230   :  { %2305 = vmatpush3.bf16.msra.mxu1 %v2770_v22 }
 0x231   :  { %2306 = vmatprep.subr.bf16.mxu1 %v2477_v0 }
 0x234   :  { %2308 = vmatpush3.bf16.msra.mxu1 %v2778_v26 }
 0x235   :  { %2116 = vmatprep.subr.mxu1 %v2479_v25 }
 0x2ea   :  { %v678_v49 = vpop.f32.mrb[2].mxu1 }
 0x2eb   :  { %v685_v50 = vrot.slane %v678_v49, %v2811_v48  ;;  %v2080_v51 = vpop.f32.mrb[3].mxu1 }
 0x2ed   :  { %v2814_v52 = vsub.f32 %v491_v28, %v685_v50  ;;  %v2816_v53 = vsub.f32 %v494_v30, %v685_v50  ;;  %v2818_v34 = vsub.f32 %v2039_v27, %v685_v50  ;;  %v2820_v55 = vsub.f32 %v2040_v29, %v685_v50  ;;  %v884_v28 = vld [vmem:[#allocation3 + $0x8] sm:$0x1]  ;;  %v887_v29 = vld [vmem:[#allocation3 + $0x14] sm:$0x1] }
 0x2ee   :  { %v881_v27 = vsel %vm2856_vm5, 0, %v880_v21  ;;  %v885_v30 = vsel %vm883_vm6, 0, %v884_v28  ;;  %v888_v31 = vsel %vm883_vm6, 0, %v887_v29 }
 0x2ef   :  { %v690_v56 = vmul.f32 %v2814_v52, %v2814_v52  ;;  %v691_v57 = vmul.f32 %v2816_v53, %v2816_v53  ;;  %v692_v58 = vmul.f32 %v2818_v34, %v2818_v34  ;;  %v693_v61 = vmul.f32 %v2820_v55, %v2820_v55  ;;  %882 = vst [vmem:[#allocation3 + $0xc] sm:$0x1] %v881_v27 }
 0x2f0   :  { %886 = vst [vmem:[#allocation3 + $0x8] sm:$0x1] %v885_v30  ;;  %889 = vst [vmem:[#allocation3 + $0x14] sm:$0x1] %v888_v31 }
 0x2f1   :  { %v694_v59 = vadd.f32 %v691_v57, %v690_v56 }
 0x2f3   :  { %v695_v62 = vadd.f32 %v694_v59, %v692_v58 }
 0x2f5   :  { %v696_v63 = vadd.f32 %v695_v62, %v693_v61 }
 0x2f6   :  { %v949_v31 = vld [vmem:[#allocation3 + $0xc] sm:$0xf] }
 0x2f7   :  { %v697_v2 = vrot.slane %v696_v63, 4  ;;  %v946_v24 = vld [vmem:[#allocation3 + $0x8] sm:$0x1]  ;;  %v953_v32 = vld [vmem:[#allocation3 + $0x14] sm:$0x1] }
 0x2f9   :  { %v698_v3 = vadd.f32 %v697_v2, %v696_v63 }
 0x2fb   :  { %v699_v4 = vrot.slane %v698_v3, 2 }
 0x2fd   :  { %v700_v5 = vadd.f32 %v699_v4, %v698_v3 }
 0x2ff   :  { %v701_v6 = vrot.slane %v700_v5, 1 }
 0x301   :  { %v702_v7 = vadd.f32 %v701_v6, %v700_v5 }
 0x303   :  { %2114 = vmatmul.mubr.f32.vlgmr.msra.gmra.mrb[4].mxu1 %v702_v7 }
 0x304   :  { %2118 = vmatprep.mubr.msk.f32.mxu1 %vm2478_vm0, %v2479_v25  ;;  %2117 = vmatpush3.msra.mxu1 %v776_v8 }
 0x305   :  { %2309 = vmatprep.subr.bf16.mxu1 %v2477_v0 }
 0x3d6   :  { %v769_v9 = vpop.f32.mrb[4].mxu1 }
 0x3d7   :  { %v773_v10 = vmul.f32 0.001953125, %v769_v9  ;;  %v2115_v12 = vpop.f32.mrb[5].mxu1 }
 0x3d8   :  { %v942_v12 = vld [vmem:[#allocation3] sm:$0xf] }
 0x3d9   :  { %v774_v13 = vadd.f32 1e-05, %v773_v10 }
 0x3db   :  { %2422 = vrsqrt.f32 %v774_v13 }
 0x3e5   :  { %v2423_v16 = vpop.eup %2422 }
 0x3e6   :  { %2119 = vmatmul.mubr.msk.f32.vlgmr.msra.gmra.mrb[6].mxu1 %vm608_vm2, %v2423_v16 }
 0x3e7   :  { %2311 = vmatpush3.bf16.msra.mxu1 %v2632_v60  ;;  %2213 = vmatprep.mubr.msk.f32.mxu1 %vm2478_vm0, %v2479_v25 }
 0x3e8   :  { %2312 = vmatprep.subr.bf16.mxu1 %v2477_v0 }
 0x3eb   :  { %2314 = vmatpush3.bf16.msra.mxu1 %v2643_v1 }
 0x3ec   :  { %2315 = vmatprep.subr.bf16.mxu1 %v2477_v0 }
 0x3ef   :  { %2317 = vmatpush3.bf16.msra.mxu1 %v2657_v14 }
 0x3f0   :  { %2318 = vmatprep.subr.bf16.mxu1 %v2477_v0 }
 0x3f3   :  { %2320 = vmatpush3.bf16.msra.mxu1 %v2737_v11 }
 0x3f4   :  { %2321 = vmatprep.subr.bf16.mxu1 %v2477_v0 }
 0x3f7   :  { %2323 = vmatpush3.bf16.msra.mxu1 %v2747_v15 }
 0x3f8   :  { %2324 = vmatprep.subr.bf16.mxu1 %v2477_v0 }
 0x3fb   :  { %2326 = vmatpush3.bf16.msra.mxu1 %v2757_v18 }
 0x3fc   :  { %2327 = vmatprep.subr.bf16.mxu1 %v2477_v0 }
 0x3ff   :  { %2329 = vmatpush3.bf16.msra.mxu1 %v2770_v22 }
 0x400   :  { %2330 = vmatprep.subr.bf16.mxu1 %v2477_v0 }
 0x403   :  { %2332 = vmatpush3.bf16.msra.mxu1 %v2778_v26 }
 0x404   :  { %2216 = vmatprep.subr.mxu1 %v2479_v25 }
 0x4b9   :  { %v846_v43 = vpop.f32.mrb[6].mxu1 }
 0x4ba   :  { %v853_v44 = vrot.slane %v846_v43, %v2811_v48  ;;  %v2120_v45 = vpop.f32.mrb[7].mxu1 }
 0x4bc   :  { %v854_v47 = vmul.f32 %v853_v44, %v2814_v52  ;;  %v855_v49 = vmul.f32 %v853_v44, %v2816_v53  ;;  %v856_v50 = vmul.f32 %v853_v44, %v2818_v34  ;;  %v857_v51 = vmul.f32 %v853_v44, %v2820_v55 }
 0x4be   :  { %v865_v56 = vadd.f32 %v1833_v46, %v854_v47  ;;  %v866_v57 = vadd.f32 %v1833_v46, %v855_v49  ;;  %v867_v58 = vadd.f32 %v1833_v46, %v856_v50  ;;  %v868_v59 = vadd.f32 %v1833_v46, %v857_v51 }
 0x4c0   :  { %v869_v61 = vmax.f32 %v865_v56, 0.0  ;;  %v870_v62 = vmax.f32 %v866_v57, 0.0  ;;  %v871_v63 = vmax.f32 %v867_v58, 0.0  ;;  %v872_v2 = vmax.f32 %v868_v59, 0.0 }
 0x4c2   :  { %v1877_v3 = vpack.c.bf16 %v869_v61, %v869_v61  ;;  %v1878_v4 = vpack.c.bf16 %v870_v62, %v870_v62  ;;  %v1879_v5 = vpack.c.bf16 %v871_v63, %v871_v63  ;;  %v1880_v6 = vpack.c.bf16 %v872_v2, %v872_v2 }
 0x4c4   :  { %v901_v7 = vshrl.u32 %v1877_v3, 16  ;;  %v909_v52 = vshrl.u32 %v1878_v4, 16  ;;  %v918_v53 = vshrl.u32 %v1879_v5, 16  ;;  %v926_v8 = vshrl.u32 %v1880_v6, 16 }
 0x4c5   :  { %v904_v9 = vshll.u32 %v1877_v3, 16  ;;  %v912_v10 = vshll.u32 %v1878_v4, 16  ;;  %v921_v16 = vshll.u32 %v1879_v5, 16  ;;  %v929_v20 = vshll.u32 %v1880_v6, 16 }
 0x4c6   :  { %v903_v34 = vrot.slane %v901_v7, 7  ;;  %v911_v55 = vrot.slane %v909_v52, 7  ;;  %v920_v13 = vrot.slane %v918_v53, 7  ;;  %v928_v17 = vrot.slane %v926_v8, 7 }
 0x4c8   :  { %v906_v27 = vor.u32 %v904_v9, %v903_v34  ;;  %v907_v28 = vrot.slane %v903_v34, 4  ;;  %v914_v29 = vor.u32 %v912_v10, %v911_v55  ;;  %v916_v30 = vrot.slane %v911_v55, 4 }
 0x4c9   :  { %v923_v33 = vor.u32 %v921_v16, %v920_v13  ;;  %v924_v36 = vrot.slane %v920_v13, 4  ;;  %v931_v37 = vor.u32 %v929_v20, %v928_v17  ;;  %v933_v38 = vrot.slane %v928_v17, 4 }
 0x4ca   :  { %v915_v39 = vsel %vm2595_vm7, %v907_v28, %v914_v29  ;;  %v943_v40 = vsel %vm2877_vm8, %v906_v27, %v942_v12  ;;  %v947_v43 = vsel %vm2856_vm5, %v916_v30, %v946_v24 }
 0x4cb   :  { %v932_v44 = vsel %vm2595_vm7, %v924_v36, %v931_v37  ;;  %944 = vst [vmem:[#allocation3] sm:$0xf] %v943_v40  ;;  %945 = vst [vmem:[#allocation3 + $0x4] sm:$0xf] %v915_v39  ;;  %v950_v45 = vsel %vm2877_vm8, %v923_v33, %v949_v31  ;;  %v954_v46 = vsel %vm2856_vm5, %v933_v38, %v953_v32 }
 0x4cc   :  { %948 = vst [vmem:[#allocation3 + $0x8] sm:$0x1] %v947_v43  ;;  %951 = vst [vmem:[#allocation3 + $0xc] sm:$0xf] %v950_v45  ;;  %v2406_v45 = vld [vmem:[#allocation4 + $0x8] sm:$0xff]  }
 0x4cd   :  { %952 = vst [vmem:[#allocation3 + $0x10] sm:$0xf] %v932_v44  ;;  %955 = vst [vmem:[#allocation3 + $0x14] sm:$0x1] %v954_v46 }
 0x4d2   :  { %v956_v47 = vld [vmem:[#allocation3] sm:$0xf]  ;;  %v2893_v49 = vld [vmem:[#allocation3 + $0x4] sm:$0xf] }
 0x4d3   :  { %v2895_v50 = vld [vmem:[#allocation3 + $0x8] sm:$0x1]  ;;  %v979_v51 = vshrl.u32 %v956_v47, 16  ;;  %v982_v35 = vshll.u32 %v956_v47, 16  ;;  %v988_v56 = vshll.u32 %v2893_v49, 16  ;;  %v992_v57 = vshrl.u32 %v2893_v49, 16 }
 0x4d4   :  { %v2899_v58 = vld [vmem:[#allocation3 + $0xc] sm:$0xf]  ;;  %v998_v59 = vshll.u32 %v2895_v50, 16  ;;  %v2902_v19 = vld [vmem:[#allocation3 + $0x10] sm:$0xf] }
 0x4d5   :  { %v1003_v61 = vshrl.u32 %v2899_v58, 16  ;;  %v981_v62 = vrot.slane %v979_v51, 4  ;;  %v984_v63 = vrot.slane %v982_v35, 5  ;;  %v990_v2 = vrot.slane %v988_v56, 5  ;;  %v977_v4 = vld [vmem:[#allocation3 + $0x14] sm:$0x1] }
 0x4d6   :  { %v994_v3 = vrot.slane %v992_v57, 4  ;;  %v1006_v6 = vshll.u32 %v2899_v58, 16  ;;  %v1012_v7 = vshll.u32 %v2902_v19, 16  ;;  %v1016_v8 = vshrl.u32 %v2902_v19, 16  ;;  %v1258_v34 = vld [vmem:[#allocation3 + $0xc] sm:$0xe] }
 0x4d7   :  { %v1005_v5 = vrot.slane %v1003_v61, 4  ;;  %v985_v52 = vor.u32 %v984_v63, %v981_v62  ;;  %v1000_v9 = vrot.slane %v998_v59, 5  ;;  %v1022_v17 = vshll.u32 %v977_v4, 16  ;;  %v2408_v35 = vld [vmem:[#allocation4 + $0x18] sm:$0xff]   ;;  %v2409_v56 = vld [vmem:[#allocation4 + $0x20] sm:$0xff]   ;;  %v2410_v57 = vld [vmem:[#allocation4 + $0x28] sm:$0xff]  }
 0x4d8   :  { %v995_v53 = vor.u32 %v994_v3, %v990_v2  ;;  %v1008_v55 = vrot.slane %v1006_v6, 5  ;;  %v1014_v10 = vrot.slane %v1012_v7, 5  ;;  %v1018_v16 = vrot.slane %v1016_v8, 4  ;;  %v2411_v59 = vld [vmem:[#allocation4 + $0x30] sm:$0xff]   ;;  %v1257_v61 = vld [vmem:[#allocation3] sm:$0xe] }
 0x4d9   :  { %v986_v12 = vrot.slane %v985_v52, 4  ;;  %v1859_v21 = vrot.slane %v1258_v34, 9  ;;  %v1272_v29 = vrot.slane %v2902_v19, 5  ;;  %v1024_v33 = vrot.slane %v1022_v17, 5  ;;  %v2414_v63 = vld [vmem:[#allocation4 + $0x80] sm:$0xff]   ;;  %v2415_v6 = vld [vmem:[#allocation4 + $0x88] sm:$0xff]  }
 0x4da   :  { %v996_v13 = vrot.slane %v995_v53, 4  ;;  %v1009_v20 = vor.u32 %v1008_v55, %v1005_v5  ;;  %v1019_v28 = vor.u32 %v1018_v16, %v1014_v10  ;;  %v1275_v37 = vrot.slane %v977_v4, 5  ;;  %v2416_v52 = vld [vmem:[#allocation4 + $0x90] sm:$0xff]   ;;  %v2418_v53 = vld [vmem:[#allocation4 + $0xa0] sm:$0xff]  }
 0x4db   :  { %v991_v24 = vsel %vm2667_vm11, %v986_v12, %v990_v2  ;;  %v1274_v36 = vrot.slane %v1272_v29, 4  ;;  %v2919_v40 = vsel %vm2700_vm15, %v1859_v21, %v1272_v29  ;;  %v1848_v51 = vcombine.low %v956_v47, %v2893_v49 }
 0x4dc   :  { %v1001_v27 = vsel %vm2667_vm11, %v996_v13, %v1000_v9  ;;  %v1010_v31 = vrot.slane %v1009_v20, 4  ;;  %v1020_v32 = vrot.slane %v1019_v28, 4  ;;  %v1265_v47 = vrot.slane %v2893_v49, 5 }
 0x4dd   :  { %v1838_v30 = vcombine.low %v991_v24, %v1001_v27  ;;  %v2923_v43 = vsel %vm2700_vm15, %v1274_v36, %v1275_v37  ;;  %v1858_v2 = vrot.slane %v1257_v61, 9  ;;  %v1268_v3 = vrot.slane %v2895_v50, 5  ;;  %v2417_v50 = vld [vmem:[#allocation4 + $0x98] sm:$0xff]  }
 0x4de   :  { %v1015_v38 = vsel %vm2667_vm11, %v1010_v31, %v1014_v10  ;;  %v1025_v39 = vsel %vm2667_vm11, %v1020_v32, %v1024_v33  ;;  %v1861_v46 = vcombine.low %v2919_v40, %v2923_v43  ;;  %v1267_v62 = vrot.slane %v1265_v47, 4 }
 0x4df   :  { %2137 = vmatprep.mubr.bf16.mxu0 %v1838_v30  ;;  %v1839_v44 = vcombine.low %v1015_v38, %v1025_v39  ;;  %v1849_v5 = vcombine.low %v2899_v58, %v2902_v19  ;;  %v1266_v49 = vsel %vm2700_vm15, %v1858_v2, %v1265_v47  ;;  %v2419_v58 = vld [vmem:[#allocation4 + $0xa8] sm:$0xff]   ;;  %v2421_v19 = vld [vmem:[#allocation4 + $0xb8] sm:$0xff]  }
 0x4e0   :  { %v1269_v4 = vsel %vm2700_vm15, %v1267_v62, %v1268_v3 }
 0x4e1   :  { %2138 = vmatmul.mubr.bf16.vlgmr.msra.gmra.mrb[4].mxu0 %v1839_v44  ;;  %v1860_v7 = vcombine.low %v1266_v49, %v1269_v4 }
 0x4e2   :  { %2142 = vmatpush3.bf16.msra.mxu0 %v2865_v41  ;;  %2157 = vmatprep.mubr.bf16.mxu0 %v1848_v51  ;;  %v2412_v41 = vld [vmem:[#allocation4 + $0x38] sm:$0xff]  }
 0x4e3   :  { %2143 = vmatprep.subr.bf16.mxu0 %v2406_v45 }
 0x4e6   :  { %2144 = vmatpush3.bf16.msra.mxu0 %v2406_v45  ;;  %v1667_v45 = vld [vmem:[%s2990_s7] sm:$0xff]  ;;  %s2480_s7 = smov [#allocation7]  }
 0x4e7   :  { %2145 = vmatprep.subr.bf16.mxu0 %v2407_v23  ;;  %s1773_s23 = sshll.u32 %s2480_s7, 4  ;;  %s1774_s23 = int_to_ptr.vmem [resolvable:$true] %s1773_s23 }
 0x4e8   :  { %p2453_p9 = scmp.lt.s32.totalorder %s1774_s23, %s1774_s23 }
 0x4ea   :  { %2146 = vmatpush3.bf16.msra.mxu0 %v2407_v23 }
 0x4eb   :  { %2147 = vmatprep.subr.bf16.mxu0 %v2408_v35 }
 0x4ee   :  { %2148 = vmatpush3.bf16.msra.mxu0 %v2408_v35 }
 0x4ef   :  { %2149 = vmatprep.subr.bf16.mxu0 %v2409_v56 }
 0x4f2   :  { %2150 = vmatpush3.bf16.msra.mxu0 %v2409_v56 }
 0x4f3   :  { %2151 = vmatprep.subr.bf16.mxu0 %v2410_v57 }
 0x4f6   :  { %2152 = vmatpush3.bf16.msra.mxu0 %v2410_v57 }
 0x4f7   :  { %2153 = vmatprep.subr.bf16.mxu0 %v2411_v59 }
 0x4fa   :  { %2154 = vmatpush3.bf16.msra.mxu0 %v2411_v59 }
 0x4fb   :  { %2155 = vmatprep.subr.bf16.mxu0 %v2412_v41 }
 0x4fe   :  { %2156 = vmatpush3.bf16.msra.mxu0 %v2412_v41 }
 0x4ff   :  { %2161 = vmatprep.subr.bf16.mxu0 %v2414_v63 }
 0x501   :  { %2158 = vmatmul.mubr.bf16.vlgmr.msra.gmra.mrb[4].mxu0 %v1849_v5 }
 0x502   :  { %2162 = vmatpush3.bf16.msra.mxu0 %v2414_v63  ;;  %2177 = vmatprep.mubr.bf16.mxu0 %v1860_v7 }
 0x503   :  { %2163 = vmatprep.subr.bf16.mxu0 %v2415_v6 }
 0x506   :  { %2164 = vmatpush3.bf16.msra.mxu0 %v2415_v6 }
 0x507   :  { %2165 = vmatprep.subr.bf16.mxu0 %v2416_v52 }
 0x50a   :  { %2166 = vmatpush3.bf16.msra.mxu0 %v2416_v52 }
 0x50b   :  { %2167 = vmatprep.subr.bf16.mxu0 %v2417_v50 }
 0x50e   :  { %2168 = vmatpush3.bf16.msra.mxu0 %v2417_v50 }
 0x50f   :  { %2169 = vmatprep.subr.bf16.mxu0 %v2418_v53 }
 0x512   :  { %2170 = vmatpush3.bf16.msra.mxu0 %v2418_v53 }
 0x513   :  { %2171 = vmatprep.subr.bf16.mxu0 %v2419_v58 }
 0x516   :  { %2172 = vmatpush3.bf16.msra.mxu0 %v2419_v58 }
 0x517   :  { %2173 = vmatprep.subr.bf16.mxu0 %v2420_v54 }
 0x51a   :  { %2174 = vmatpush3.bf16.msra.mxu0 %v2420_v54 }
 0x51b   :  { %2175 = vmatprep.subr.bf16.mxu0 %v2421_v19 }
 0x51e   :  { %2176 = vmatpush3.bf16.msra.mxu0 %v2421_v19 }
 0x521   :  { %2178 = vmatmul.mubr.bf16.vlgmr.msra.gmra.mrb[4].mxu0 %v1861_v46 }
 0x5f4   :  { %v2179_v8 = vpop.f32.mrb[4].mxu0 }
 0x5f5   :  { %v1384_v34 = vpop.f32.mrb[5].mxu0 }
 0x5f6   :  { %v2180_v9 = vpop.f32.mrb[6].mxu0 }
 0x5f7   :  { %v1387_v55 = vpop.f32.mrb[7].mxu0 }
 0x5f8   :  { %v1419_v10 = vadd.f32 %v1387_v55, %v1384_v34 }
 0x5fa   :  { %v1420_v12 = vadd.f32 %v2179_v8, %v1419_v10 }
 0x5fc   :  { %v1421_v13 = vadd.f32 %v2180_v9, %v1420_v12 }
 0x5fe   :  { %v1422_v16 = vrot.slane %v1421_v13, 4 }
 0x600   :  { %v1423_v17 = vadd.f32 %v1422_v16, %v1421_v13 }
 0x602   :  { %v1424_v20 = vrot.slane %v1423_v17, 2 }
 0x604   :  { %v1425_v21 = vadd.f32 %v1424_v20, %v1423_v17 }
 0x606   :  { %v1426_v24 = vrot.slane %v1425_v21, 1 }
 0x608   :  { %v1427_v27 = vadd.f32 %v1426_v24, %v1425_v21 }
 0x60a   :  { %2214 = vmatmul.mubr.f32.vlgmr.msra.gmra.mrb[8].mxu1 %v1427_v27 }
 0x60b   :  { %2217 = vmatpush3.msra.mxu1 %v2786_v42  ;;  %2218 = vmatprep.mubr.msk.f32.mxu1 %vm2478_vm0, %v2479_v25 }
 0x60c   :  { %2333 = vmatprep.subr.bf16.mxu1 %v2477_v0 }
 0x6dd   :  { %v1494_v28 = vpop.f32.mrb[8].mxu1 }
 0x6de   :  { %v1498_v29 = vmul.f32 0.001953125, %v1494_v28  ;;  %v2215_v30 = vpop.f32.mrb[9].mxu1 }
 0x6e0   :  { %2219 = vmatmul.mubr.msk.f32.vlgmr.msra.gmra.mrb[10].mxu1 %vm608_vm2, %v1498_v29 }
 0x6e1   :  { %2335 = vmatpush3.bf16.msra.mxu1 %v2632_v60  ;;  %2253 = vmatprep.mubr.msk.f32.mxu1 %vm2478_vm0, %v2479_v25 }
 0x6e2   :  { %2336 = vmatprep.subr.bf16.mxu1 %v2477_v0 }
 0x6e5   :  { %2338 = vmatpush3.bf16.msra.mxu1 %v2643_v1 }
 0x6e6   :  { %2339 = vmatprep.subr.bf16.mxu1 %v2477_v0 }
 0x6e9   :  { %2341 = vmatpush3.bf16.msra.mxu1 %v2657_v14 }
 0x6ea   :  { %2342 = vmatprep.subr.bf16.mxu1 %v2477_v0 }
 0x6ed   :  { %2344 = vmatpush3.bf16.msra.mxu1 %v2737_v11 }
 0x6ee   :  { %2345 = vmatprep.subr.bf16.mxu1 %v2477_v0 }
 0x6f1   :  { %2347 = vmatpush3.bf16.msra.mxu1 %v2747_v15 }
 0x6f2   :  { %2348 = vmatprep.subr.bf16.mxu1 %v2477_v0 }
 0x6f5   :  { %2350 = vmatpush3.bf16.msra.mxu1 %v2757_v18 }
 0x6f6   :  { %2351 = vmatprep.subr.bf16.mxu1 %v2477_v0 }
 0x6f9   :  { %2353 = vmatpush3.bf16.msra.mxu1 %v2770_v22 }
 0x6fa   :  { %2354 = vmatprep.subr.bf16.mxu1 %v2477_v0 }
 0x6fd   :  { %2356 = vmatpush3.bf16.msra.mxu1 %v2778_v26 }
 0x6fe   :  { %2256 = vmatprep.subr.mxu1 %v2479_v25 }
 0x7b3   :  { %v1569_v60 = vpop.f32.mrb[10].mxu1 }
 0x7b4   :  { %v1576_v1 = vrot.slane %v1569_v60, %v2811_v48  ;;  %v2220_v14 = vpop.f32.mrb[11].mxu1 }
 0x7b6   :  { %v1577_v11 = vsub.f32 %v1384_v34, %v1576_v1  ;;  %v1578_v15 = vsub.f32 %v1387_v55, %v1576_v1  ;;  %v1579_v42 = vsub.f32 %v2179_v8, %v1576_v1  ;;  %v1580_v31 = vsub.f32 %v2180_v9, %v1576_v1 }
 0x7b8   :  { %v1581_v32 = vmul.f32 %v1577_v11, %v1577_v11  ;;  %v1582_v18 = vmul.f32 %v1578_v15, %v1578_v15  ;;  %v1583_v33 = vmul.f32 %v1579_v42, %v1579_v42  ;;  %v1584_v37 = vmul.f32 %v1580_v31, %v1580_v31 }
 0x7ba   :  { %v1585_v36 = vadd.f32 %v1582_v18, %v1581_v32 }
 0x7bc   :  { %v1586_v22 = vadd.f32 %v1585_v36, %v1583_v33 }
 0x7be   :  { %v1587_v38 = vadd.f32 %v1586_v22, %v1584_v37 }
 0x7c0   :  { %v1588_v0 = vrot.slane %v1587_v38, 4 }
 0x7c2   :  { %v1589_v39 = vadd.f32 %v1588_v0, %v1587_v38 }
 0x7c4   :  { %v1590_v26 = vrot.slane %v1589_v39, 2 }
 0x7c6   :  { %v1591_v40 = vadd.f32 %v1590_v26, %v1589_v39 }
 0x7c8   :  { %v1592_v43 = vrot.slane %v1591_v40, 1 }
 0x7ca   :  { %v1593_v44 = vadd.f32 %v1592_v43, %v1591_v40 }
 0x7cc   :  { %2254 = vmatmul.mubr.f32.vlgmr.msra.gmra.mrb[12].mxu1 %v1593_v44 }
 0x7cd   :  { %2258 = vmatprep.mubr.msk.f32.mxu1 %vm2478_vm0, %v2479_v25  ;;  %2257 = vmatpush3.msra.mxu1 %v1667_v45  ;;  %v1872_v25 = vld [vmem:[%s2991_s8] ss:$0 sm:$0xff]  ;;  %s2448_s8 = scalar_lea.vmem %s1774_s23, 512 }
 0x7ce   :  { %p2449_p8 = scmp.ne.s32.totalorder %s1774_s23, %s2448_s8  ;;  %p2454_p10 = scmp.lt.s32.totalorder %s2448_s8, %s2448_s8 }
 0x7d0   :  { %p2455_p11 = por %p2454_p10, %p2453_p9 }
 0x7d2   :  { %p2456_p12 = pnand %p2455_p11, %p2449_p8 }
 0x89f   :  { %v1660_v46 = vpop.f32.mrb[12].mxu1 }
 0x8a0   :  { %v1664_v51 = vmul.f32 0.001953125, %v1660_v46  ;;  %v2255_v23 = vpop.f32.mrb[13].mxu1 }
 0x8a2   :  { %v1665_v35 = vadd.f32 1e-05, %v1664_v51 }
 0x8a4   :  { %2424 = vrsqrt.f32 %v1665_v35 }
 0x8ae   :  { %v2425_v56 = vpop.eup %2424 }
 0x8af   :  { %2259 = vmatmul.mubr.msk.f32.vlgmr.msra.gmra.mrb[14].mxu1 %vm608_vm2, %v2425_v56 }
 0x982   :  { %v1737_v57 = vpop.f32.mrb[14].mxu1 }
 0x983   :  { %v1744_v59 = vrot.slane %v1737_v57, %v2811_v48  ;;  %v2260_v47 = vpop.f32.mrb[15].mxu1 }
 0x985   :  { %v1745_v41 = vmul.f32 %v1744_v59, %v1577_v11  ;;  %v1746_v61 = vmul.f32 %v1744_v59, %v1578_v15  ;;  %v1747_v62 = vmul.f32 %v1744_v59, %v1579_v42  ;;  %v1748_v63 = vmul.f32 %v1744_v59, %v1580_v31 }
 0x987   :  { %v1756_v2 = vadd.f32 %v1872_v25, %v1745_v41  ;;  %v1757_v3 = vadd.f32 %v1872_v25, %v1746_v61  ;;  %v1758_v4 = vadd.f32 %v1872_v25, %v1747_v62  ;;  %v1759_v5 = vadd.f32 %v1872_v25, %v1748_v63 }
 0x989   :  { %v1760_v49 = vmax.f32 %v1756_v2, 0.0  ;;  %v1761_v6 = vmax.f32 %v1757_v3, 0.0  ;;  %v1762_v7 = vmax.f32 %v1758_v4, 0.0  ;;  %v1763_v52 = vmax.f32 %v1759_v5, 0.0 }
 0x98b   :  { %1764 = vst [vmem:[#allocation7] sm:$0xff] %v1760_v49  ;;  %1765 = vst [vmem:[#allocation7 + $0x8] sm:$0xff] %v1761_v6 }
 0x98c   :  { %1766 = vst [vmem:[#allocation7 + $0x10] sm:$0xff] %v1762_v7  ;;  %1767 = vst [vmem:[#allocation7 + $0x18] sm:$0xff] %v1763_v52 }
 0x98d   :  { %2459 = shalt.err (!%p2456_p12)
}
 0x98e   :  { %s2460_s25 = scalar_lea.hbm %s2992_s9, 512 }
 0x98f   :  { %p2461_p13 = scmp.ne.s32.totalorder %s2992_s9, %s2460_s25  ;;  %p2464_p0 = scmp.lt.u32.totalorder %s2460_s25, %s2992_s9 }
 0x991   :  { %p2466_p1 = pnand %p2464_p0, %p2461_p13 }
 0x993   :  { %2469 = shalt.err (!%p2466_p1)
}
 0x994   :  { %s2481_s29 = smov 128   ;;  %s2482_s30 = smov 8  }
 0x995   :  { %1779 = dma.vmem_to_hbm [thread:$0]  %s1774_s23, 512, %s2992_s9, [#allocation6], %s2481_s29, %s2481_s29, %s2482_s30  }
 0x996   :  { %2472 = dma.done.wait [#allocation6], 512  }
 0x997   :  { %2473 = vsyncadd [#allocation6], 4294966784 }
 0x998   :  { %1783 = vsyncpa [#allocation5], 1 }
 0x999   :  { %1784 = vsyncpa [#allocation6], 1 }

</bundles_post_ra>
